<compile_context>
chip_gen: v7x
topology: tpu7x:2x2x1
jax: 0.10.0
libtpu: 0.0.40
codegen_flags: <defaults>
</compile_context>

<pallas_src>
import jax
import jax.numpy as jnp
from jax.experimental import pallas as pl
from jax.experimental.pallas import tpu as pltpu


# ---------------------------------------------------------------------------
# Packed-parameter layout
# ---------------------------------------------------------------------------

def _round_up(x, m):
    return ((x + m - 1) // m) * m


def _actor_layout(input_dim, fc1_dims, fc2_dims, n_actions):
    """Static row offsets of each weight/bias slab in the packed buffer."""
    d_in_p = _round_up(input_dim, 8)                       # sublane-aligned
    hidden = _round_up(max(fc1_dims, fc2_dims, n_actions), 128)  # lane-dense
    o_w1 = 0
    o_b1 = o_w1 + d_in_p
    o_w2 = o_b1 + 8
    o_b2 = o_w2 + hidden
    o_w3 = o_b2 + 8
    o_b3 = o_w3 + hidden
    rows = o_b3 + 8
    return d_in_p, hidden, rows, (o_w1, o_b1, o_w2, o_b2, o_w3, o_b3)


def pack_actor_params(w1, b1, w2, b2, w3, b3):
    """Pack (in,out) weights and (1,out) biases into one (rows, hidden) buffer.

    Real values occupy the top-left corner of each slab; padding is zero, so
    the padded matmuls are numerically identical to the unpadded ones."""
    input_dim, fc1_dims = w1.shape
    fc2_dims = w2.shape[1]
    n_actions = w3.shape[1]
    _, hidden, rows, (o_w1, o_b1, o_w2, o_b2, o_w3, o_b3) = _actor_layout(
        input_dim, fc1_dims, fc2_dims, n_actions)

    p = jnp.zeros((rows, hidden), jnp.float32)
    p = p.at[o_w1:o_w1 + input_dim, :fc1_dims].set(w1.astype(jnp.float32))
    p = p.at[o_b1, :fc1_dims].set(b1.reshape(-1).astype(jnp.float32))
    p = p.at[o_w2:o_w2 + fc1_dims, :fc2_dims].set(w2.astype(jnp.float32))
    p = p.at[o_b2, :fc2_dims].set(b2.reshape(-1).astype(jnp.float32))
    p = p.at[o_w3:o_w3 + fc2_dims, :n_actions].set(w3.astype(jnp.float32))
    p = p.at[o_b3, :n_actions].set(b3.reshape(-1).astype(jnp.float32))
    return p


# ---------------------------------------------------------------------------
# Kernel
# ---------------------------------------------------------------------------

def _make_actor_kernel(d_in_p, hidden, offs):
    o_w1, o_b1, o_w2, o_b2, o_w3, o_b3 = offs

    def kernel(x_ref, p_ref, o_ref):
        """Fused fc1 -> relu -> fc2 -> relu -> pi -> tanh on one batch tile.

        x_ref: (bt, d_in_p)   p_ref: (rows, hidden)   o_ref: (bt, hidden)."""
        x = x_ref[...]
        # Static, 8-row-aligned slices into the single packed parameter buffer.
        w1 = p_ref[o_w1:o_w1 + d_in_p, :]
        b1 = p_ref[o_b1:o_b1 + 1, :]
        w2 = p_ref[o_w2:o_w2 + hidden, :]
        b2 = p_ref[o_b2:o_b2 + 1, :]
        w3 = p_ref[o_w3:o_w3 + hidden, :]
        b3 = p_ref[o_b3:o_b3 + 1, :]

        h1 = jnp.maximum(
            jnp.dot(x, w1, preferred_element_type=jnp.float32) + b1, 0.0)
        h2 = jnp.maximum(
            jnp.dot(h1, w2, preferred_element_type=jnp.float32) + b2, 0.0)
        a = jnp.dot(h2, w3, preferred_element_type=jnp.float32) + b3
        # Full 128-lane-wide store (unmasked vst); padded lanes are tanh(0)=0
        # and are sliced off in the wrapper.
        o_ref[...] = jnp.tanh(a).astype(o_ref.dtype)

    return kernel


# ---------------------------------------------------------------------------
# Wrapper
# ---------------------------------------------------------------------------

def make_actor_forward(input_dim, fc1_dims, fc2_dims, n_actions, block_b=128):
    """Build a jitted forward(states, packed_params) -> (B, n_actions)."""
    d_in_p, hidden, rows, offs = _actor_layout(
        input_dim, fc1_dims, fc2_dims, n_actions)
    kernel = _make_actor_kernel(d_in_p, hidden, offs)

    @jax.jit
    def forward(states, packed):
        B = states.shape[0]
        bt = min(block_b, _round_up(B, 8))      # sublane-full batch tile
        Bp = _round_up(B, bt)

        x = states.astype(jnp.float32)
        if Bp != B or d_in_p != input_dim:      # static (trace-time) decision
            x = jnp.pad(x, ((0, Bp - B), (0, d_in_p - input_dim)))

        out = pl.pallas_call(
            kernel,
            out_shape=jax.ShapeDtypeStruct((Bp, hidden), jnp.float32),
            grid=(Bp // bt,),
            in_specs=[
                # batch tile: one block per grid step
                pl.BlockSpec((bt, d_in_p), lambda i: (i, 0)),
                # packed params: constant block index -> DMA'd once, stays
                # resident in VMEM across the whole grid
                pl.BlockSpec((rows, hidden), lambda i: (0, 0)),
            ],
            out_specs=pl.BlockSpec((bt, hidden), lambda i: (i, 0)),
            compiler_params=pltpu.CompilerParams(
                dimension_semantics=("parallel",)),   # v7x: shard over 2 TCs
        )(x, packed)

        return out[:B, :n_actions]

    return forward


# ---------------------------------------------------------------------------
# Init + pure-JAX reference
# ---------------------------------------------------------------------------

def init_actor_params(key, input_dim, fc1_dims, fc2_dims, n_actions):
    """nn.Linear-style U(-1/sqrt(fan_in), 1/sqrt(fan_in)); weights as (in, out)."""
    def linear(k, fan_in, fan_out):
        kw, kb = jax.random.split(k)
        bound = 1.0 / jnp.sqrt(jnp.float32(fan_in))
        w = jax.random.uniform(kw, (fan_in, fan_out), jnp.float32, -bound, bound)
        b = jax.random.uniform(kb, (1, fan_out), jnp.float32, -bound, bound)
        return w, b

    k1, k2, k3 = jax.random.split(key, 3)
    w1, b1 = linear(k1, input_dim, fc1_dims)
    w2, b2 = linear(k2, fc1_dims, fc2_dims)
    w3, b3 = linear(k3, fc2_dims, n_actions)
    return w1, b1, w2, b2, w3, b3


def reference_forward(state, w1, b1, w2, b2, w3, b3):
    h1 = jnp.maximum(state @ w1 + b1, 0.0)
    h2 = jnp.maximum(h1 @ w2 + b2, 0.0)
    return jnp.tanh(h2 @ w3 + b3)


# ---------------------------------------------------------------------------
# Demo
# ---------------------------------------------------------------------------

if __name__ == "__main__":
    # Shapes implied by the module: input_dims=(8,), fc1=32, fc2=32, n_actions=4.
    input_dim, fc1_dims, fc2_dims, n_actions = 8, 32, 32, 4

    key = jax.random.PRNGKey(0)
    kp, ks = jax.random.split(key)
    raw_params = init_actor_params(kp, input_dim, fc1_dims, fc2_dims, n_actions)
    packed = pack_actor_params(*raw_params)             # packed once, reused

    forward = make_actor_forward(input_dim, fc1_dims, fc2_dims, n_actions)

    # Batched call: 256 env/rollout states -> two 128-row tiles over the grid,
    # parameters DMA'd once and resident across both tiles.
    states = jax.random.normal(ks, (256, input_dim), jnp.float32)
    actions = jax.block_until_ready(forward(states, packed))
    ref = reference_forward(states, *raw_params)
    assert actions.shape == (256, n_actions)
    assert jnp.allclose(actions, ref, atol=1e-5, rtol=1e-5)

    # Single-state call (mimics PyTorch's `T.tensor([state])` batch of 1).
    single_action = jax.block_until_ready(forward(states[:1], packed))
    assert single_action.shape == (1, n_actions)
    assert jnp.allclose(single_action, ref[:1], atol=1e-5, rtol=1e-5)

    # TODO(synk): optimizer / save / load / device plumbing of the nn.Module is
    # training-side bookkeeping with no kernel equivalent; only forward is here.
    print("KERNEL_OK")
</pallas_src>

<mosaic_0001>
module attributes {stable_mosaic.version = 11 : i64} {
  func.func @kernel(%arg0: i32, %arg1: memref<128x8xf32, #tpu.memory_space<vmem>>, %arg2: memref<288x128xf32, #tpu.memory_space<vmem>>, %arg3: memref<128x128xf32, #tpu.memory_space<vmem>>) attributes {dimension_semantics = [#tpu.dimension_semantics<parallel>], iteration_bounds = array<i64: 2>, scalar_prefetch = 0 : i64, scratch_operands = 0 : i64, tpu.core_type = #tpu.core_type<tc>, window_params = [{transform_indices = @transform_0, window_bounds = array<i64: 128, 8>}, {pipeline_mode = #tpu.pipeline_mode<synchronous>, transform_indices = @transform_1, window_bounds = array<i64: 288, 128>}, {transform_indices = @transform_2, window_bounds = array<i64: 128, 128>}]} {
    %c0 = arith.constant 0 : index
    %c0_0 = arith.constant 0 : index
    %0 = vector.load %arg1[%c0, %c0_0] : memref<128x8xf32, #tpu.memory_space<vmem>>, vector<128x8xf32>
    %c0_1 = arith.constant 0 : index
    %c0_2 = arith.constant 0 : index
    %1 = vector.load %arg2[%c0_1, %c0_2] : memref<288x128xf32, #tpu.memory_space<vmem>>, vector<8x128xf32>
    %c8 = arith.constant 8 : index
    %c0_3 = arith.constant 0 : index
    %2 = vector.load %arg2[%c8, %c0_3] : memref<288x128xf32, #tpu.memory_space<vmem>>, vector<1x128xf32>
    %c16 = arith.constant 16 : index
    %c0_4 = arith.constant 0 : index
    %3 = vector.load %arg2[%c16, %c0_4] : memref<288x128xf32, #tpu.memory_space<vmem>>, vector<128x128xf32>
    %c144 = arith.constant 144 : index
    %c0_5 = arith.constant 0 : index
    %4 = vector.load %arg2[%c144, %c0_5] : memref<288x128xf32, #tpu.memory_space<vmem>>, vector<1x128xf32>
    %c152 = arith.constant 152 : index
    %c0_6 = arith.constant 0 : index
    %5 = vector.load %arg2[%c152, %c0_6] : memref<288x128xf32, #tpu.memory_space<vmem>>, vector<128x128xf32>
    %c280 = arith.constant 280 : index
    %c0_7 = arith.constant 0 : index
    %6 = vector.load %arg2[%c280, %c0_7] : memref<288x128xf32, #tpu.memory_space<vmem>>, vector<1x128xf32>
    %cst = arith.constant dense<0.000000e+00> : vector<128x128xf32>
    %7 = tpu.matmul %0, %1, %cst {dimension_numbers = #tpu.dot_dimension_numbers<[1], [0], [0], [1], [0, 0, 1, 1], [], []>} : vector<128x8xf32>, vector<8x128xf32>, vector<128x128xf32> -> vector<128x128xf32>
    %8 = vector.broadcast %2 : vector<1x128xf32> to vector<128x128xf32>
    %9 = arith.addf %7, %8 : vector<128x128xf32>
    %cst_8 = arith.constant 0.000000e+00 : f32
    %10 = vector.broadcast %cst_8 : f32 to vector<128x128xf32>
    %11 = arith.maximumf %9, %10 : vector<128x128xf32>
    %cst_9 = arith.constant dense<0.000000e+00> : vector<128x128xf32>
    %12 = tpu.matmul %11, %3, %cst_9 {dimension_numbers = #tpu.dot_dimension_numbers<[1], [0], [0], [1], [0, 0, 1, 1], [], []>} : vector<128x128xf32>, vector<128x128xf32>, vector<128x128xf32> -> vector<128x128xf32>
    %13 = vector.broadcast %4 : vector<1x128xf32> to vector<128x128xf32>
    %14 = arith.addf %12, %13 : vector<128x128xf32>
    %cst_10 = arith.constant 0.000000e+00 : f32
    %15 = vector.broadcast %cst_10 : f32 to vector<128x128xf32>
    %16 = arith.maximumf %14, %15 : vector<128x128xf32>
    %cst_11 = arith.constant dense<0.000000e+00> : vector<128x128xf32>
    %17 = tpu.matmul %16, %5, %cst_11 {dimension_numbers = #tpu.dot_dimension_numbers<[1], [0], [0], [1], [0, 0, 1, 1], [], []>} : vector<128x128xf32>, vector<128x128xf32>, vector<128x128xf32> -> vector<128x128xf32>
    %18 = vector.broadcast %6 : vector<1x128xf32> to vector<128x128xf32>
    %19 = arith.addf %17, %18 : vector<128x128xf32>
    %20 = math.tanh %19 : vector<128x128xf32>
    %c0_12 = arith.constant 0 : index
    %c0_13 = arith.constant 0 : index
    %21 = vector.load %arg3[%c0_12, %c0_13] : memref<128x128xf32, #tpu.memory_space<vmem>>, vector<128x128xf32>
    tpu.vector_store %arg3[%c0_12, %c0_13], %20 {strides = array<i32>} : memref<128x128xf32, #tpu.memory_space<vmem>>, vector<128x128xf32>,
    return
  }
  func.func @transform_0(%arg0: i32) -> (i32, i32) {
    %c0_i32 = arith.constant 0 : i32
    %c0_i32_0 = arith.constant 0 : i32
    return %arg0, %c0_i32 : i32, i32
  }
  func.func @transform_1(%arg0: i32) -> (i32, i32) {
    %c0_i32 = arith.constant 0 : i32
    %c0_i32_0 = arith.constant 0 : i32
    %c0_i32_1 = arith.constant 0 : i32
    return %c0_i32, %c0_i32_0 : i32, i32
  }
  func.func @transform_2(%arg0: i32) -> (i32, i32) {
    %c0_i32 = arith.constant 0 : i32
    %c0_i32_0 = arith.constant 0 : i32
    return %arg0, %c0_i32 : i32, i32
  }
}

</mosaic_0001>

<bundles_post_ra>
// kernel: forward.1
= control target key start
LH: loop header
LB: loop body
LE: loop exit
PB: predicated region body
PF: predicated region fallthrough
CT: control target
= control target key end

     0   :  { %7 = vsyncpa [#allocation3], 0  ;;  %s1268_s9 = smov 0   ;;  %s1404_s0 = inlined_call_operand.vmem [shape: f32[256,8], index: 0, kind: input, shape index: {}]   ;;  %s1405_s1 = inlined_call_operand.hbm [shape: f32[288,128], index: 1, kind: input, shape index: {}]   ;;  %s1406_s2 = inlined_call_operand.vmem [shape: f32[256,128], index: 2, kind: output, shape index: {}]  }
   0x1 LB: > { %s842_s10 = sadd.s32 4294967295, %s1248_s9   ;;  %p844_p0 = scmp.ge.s32.totalorder %s1248_s9, 1  ;;  %s1248_s9 = sphi %s1268_s9, %s13_s9  }
   0x2   : > { %p91_p1 = scmp.lt.s32.totalorder %s1248_s9, 3  ;;  %s1250_s11 = smov [#allocation2]  }
   0x3   : > { %s103_s12 = sshll.u32 %s1250_s11, 4  ;;  %p1282_p3 = scmp.eq.s32.totalorder %s842_s10, 0  ;;  %s104_s12 = int_to_ptr.vmem [resolvable:$true] %s103_s12 }
   0x4   : > { %p1276_p2 = pnand %p844_p0, %p91_p1  ;;  %s1210_s18 = scalar_lea.hbm %s1405_s1, 4608 }
   0x5   : > { %s1411_s14 = scalar_select %p1282_p3, 1, 0 }
   0x6   : > { %s1410_s13 = scalar_select %p1276_p2, 1, 0 }
   0x7   : > { %p1161_p4 = pneg %p1276_p2  ;;  %p1211_p6 = scmp.ne.s32.totalorder %s1405_s1, %s1210_s18 }
   0x8   : > { %p1217_p10 = scmp.lt.u32.totalorder %s1210_s18, %s1405_s1 }
   0x9   : > { %p1290_p5 = pnand %p1282_p3, %p1161_p4 }
   0xb   : > { %p1212_p7 = pneg %p1290_p5 }
   0xd   : > { %p1213_p8 = pnand %p1212_p7, %p1211_p6 }
   0xf   : > { %p1214_p9 = pneg %p1213_p8 }
  0x11   : > { %p1219_p11 = pnand %p1217_p10, %p1214_p9 }
  0x13   : > { %1222 = shalt.err (!%p1219_p11)
}
  0x14   : > { %s1223_s23 = scalar_lea.vmem %s104_s12, 4608  ;;  %p1231_p1 = scmp.lt.s32.totalorder %s104_s12, %s104_s12 }
  0x15   : > { %p1224_p12 = scmp.ne.s32.totalorder %s104_s12, %s1223_s23  ;;  %p1232_p4 = scmp.lt.s32.totalorder %s1223_s23, %s1223_s23 }
  0x17   : > { %p1226_p13 = pnand %p1224_p12, %p1212_p7  ;;  %p1233_p3 = por %p1232_p4, %p1231_p1 }
  0x19   : > { %p1227_p0 = pneg %p1226_p13 }
  0x1b   : > { %p1234_p2 = pnand %p1233_p3, %p1227_p0 }
  0x1d   : > { %1237 = shalt.err (!%p1234_p2)
}
  0x1e   : > { %s1251_s24 = smov 128   ;;  %s1252_s25 = smov 8  }
  0x1f   : > { %1164 = dma.hbm_to_vmem [thread:$0]  (!%p1290_p5), %s1405_s1, 4608, %s104_s12, [#allocation3], %s1251_s24, %s1251_s24, %s1252_s25  }
  0x20   : > { %p1413_p6 = scmp.ne.s32.totalorder %s1410_s13, 0 }
  0x21   : > { %p1414_p8 = scmp.ne.s32.totalorder (!%p1413_p6), %s1411_s14, 0 }
  0x22   : > { %128 = sbr.rel (%p1413_p6) target bundleno = 741 (0x2e5), region = 28 }
  0x29   : > { %1243 = dma.done.wait (%p1414_p8), [#allocation3], 4608  }
  0x2a   : > { %1245 = vsyncadd (%p1414_p8), [#allocation3], 4294962688  ;;  %s849_s28 = sshll.u32 %s842_s10, 4  ;;  %vm218_vm0 = vcmask 64512   ;;  %v178_v0 = vld [vmem:[#allocation2] sm:$0xff]  ;;  %v180_v6 = vld [vmem:[#allocation2 + $0x10] sm:$0xff] }
  0x2b   : > { %p151_p2 = scmp.lt.s32.totalorder %s849_s28, 31  ;;  %955 = vmatprep.subr.mxu0 %v178_v0  ;;  %v181_v7 = vld [vmem:[#allocation2 + $0x18] sm:$0xff]  ;;  %v182_v8 = vld [vmem:[#allocation2 + $0x20] sm:$0xff]  ;;  %v183_v9 = vld [vmem:[#allocation2 + $0x28] sm:$0xff] }
  0x2c   : > { %956 = vmatpush3.msra.mxu0 %v178_v0  ;;  %v1093_v10 = vpack.c.bf16 %v181_v7, %v180_v6  ;;  %v1097_v11 = vpack.c.bf16 %v183_v9, %v182_v8  ;;  %v184_v13 = vld [vmem:[#allocation2 + $0x30] sm:$0xff]  ;;  %v185_v14 = vld [vmem:[#allocation2 + $0x38] sm:$0xff]  ;;  %v186_v18 = vld [vmem:[#allocation2 + $0x40] sm:$0xff] }
  0x2d   : > { %s1416_s28 = smov (!%p151_p2, %s849_s28), 31  ;;  %v1101_v16 = vpack.c.bf16 %v185_v14, %v184_v13  ;;  %v187_v19 = vld [vmem:[#allocation2 + $0x48] sm:$0xff]  ;;  %v188_v23 = vld [vmem:[#allocation2 + $0x50] sm:$0xff]  ;;  %v189_v24 = vld [vmem:[#allocation2 + $0x58] sm:$0xff] }
  0x2e   : > { %s850_s29 = sshll.u32 %s1416_s28, 3  ;;  %1094 = vmatprep.subr.bf16.mxu1 %v1093_v10  ;;  %v1105_v21 = vpack.c.bf16 %v187_v19, %v186_v18  ;;  %v1109_v26 = vpack.c.bf16 %v189_v24, %v188_v23  ;;  %v190_v28 = vld [vmem:[#allocation2 + $0x60] sm:$0xff]  ;;  %v191_v29 = vld [vmem:[#allocation2 + $0x68] sm:$0xff]  ;;  %v192_v33 = vld [vmem:[#allocation2 + $0x70] sm:$0xff] }
  0x2f   : > { %s1326_s4 = scalar_lea.vmem %s1404_s0, %s850_s29  ;;  %1096 = vmatpush3.bf16.msra.mxu1 %v1093_v10  ;;  %v1113_v31 = vpack.c.bf16 %v191_v29, %v190_v28  ;;  %v193_v34 = vld [vmem:[#allocation2 + $0x78] sm:$0xff]  ;;  %v194_v38 = vld [vmem:[#allocation2 + $0x80] sm:$0xff]  ;;  %v195_v39 = vld [vmem:[#allocation2 + $0x88] sm:$0xff]  ;;  %s1373_s7 = scalar_lea.vmem %s1406_s2, %s850_s29 }
  0x30   : > { %v162_v1 = vld [vmem:[%s1326_s4] sm:$0xff]  ;;  %v163_v2 = vld [vmem:[%s1326_s4 + $0x8] sm:$0xff]  ;;  %v164_v3 = vld [vmem:[%s1326_s4 + $0x10] sm:$0xff]  ;;  %1098 = vmatprep.subr.bf16.mxu1 %v1097_v11  ;;  %v1117_v36 = vpack.c.bf16 %v193_v34, %v192_v33  ;;  %v1121_v40 = vpack.c.bf16 %v195_v39, %v194_v38 }
  0x31   : > { %957 = vmatprep.mubr.msk.f32.mxu0 %vm218_vm0, %v162_v1  ;;  %v165_v4 = vld [vmem:[%s1326_s4 + $0x18] sm:$0xff]  ;;  %v166_v5 = vld [vmem:[%s1326_s4 + $0x20] sm:$0xff]  ;;  %v167_v12 = vld [vmem:[%s1326_s4 + $0x28] sm:$0xff] }
  0x32   : > { %958 = vmatmul.mubr.msk.f32.vlgmr.msra.gmra.mrb[0].mxu0 %vm218_vm0, %v163_v2  ;;  %v168_v15 = vld [vmem:[%s1326_s4 + $0x30] sm:$0xff]  ;;  %v169_v17 = vld [vmem:[%s1326_s4 + $0x38] sm:$0xff]  ;;  %v170_v20 = vld [vmem:[%s1326_s4 + $0x40] sm:$0xff] }
  0x33   : > { %960 = vmatprep.mubr.msk.f32.mxu0 %vm218_vm0, %v164_v3  ;;  %1100 = vmatpush3.bf16.msra.mxu1 %v1097_v11  ;;  %v171_v22 = vld [vmem:[%s1326_s4 + $0x48] sm:$0xff]  ;;  %v172_v25 = vld [vmem:[%s1326_s4 + $0x50] sm:$0xff]  ;;  %v173_v27 = vld [vmem:[%s1326_s4 + $0x58] sm:$0xff] }
  0x34   : > { %1102 = vmatprep.subr.bf16.mxu1 %v1101_v16  ;;  %v174_v30 = vld [vmem:[%s1326_s4 + $0x60] sm:$0xff]  ;;  %v175_v32 = vld [vmem:[%s1326_s4 + $0x68] sm:$0xff]  ;;  %v176_v35 = vld [vmem:[%s1326_s4 + $0x70] sm:$0xff] }
  0x35   : > { %v177_v37 = vld [vmem:[%s1326_s4 + $0x78] sm:$0xff]  ;;  %v198_v42 = vld [vmem:[#allocation2 + $0xa0] sm:$0xff]  ;;  %v199_v43 = vld [vmem:[#allocation2 + $0xa8] sm:$0xff] }
  0x36   : > { %961 = vmatmul.mubr.msk.f32.gmra.mrb[2].mxu0 %vm218_vm0, %v165_v4  ;;  %v197_v41 = vld [vmem:[#allocation2 + $0x98] sm:$0xff]  ;;  %v200_v45 = vld [vmem:[#allocation2 + $0xb0] sm:$0xff]  ;;  %v202_v48 = vld [vmem:[#allocation2 + $0xc0] sm:$0xff] }
  0x37   : > { %963 = vmatprep.mubr.msk.f32.mxu0 %vm218_vm0, %v166_v5  ;;  %1104 = vmatpush3.bf16.msra.mxu1 %v1101_v16  ;;  %v1125_v44 = vpack.c.bf16 %v198_v42, %v197_v41  ;;  %v1129_v46 = vpack.c.bf16 %v200_v45, %v199_v43  ;;  %v201_v47 = vld [vmem:[#allocation2 + $0xb8] sm:$0xff]  ;;  %v203_v50 = vld [vmem:[#allocation2 + $0xc8] sm:$0xff]  ;;  %v204_v51 = vld [vmem:[#allocation2 + $0xd0] sm:$0xff] }
  0x38   : > { %1106 = vmatprep.subr.bf16.mxu1 %v1105_v21  ;;  %v1133_v49 = vpack.c.bf16 %v202_v48, %v201_v47  ;;  %v1137_v52 = vpack.c.bf16 %v204_v51, %v203_v50  ;;  %v205_v53 = vld [vmem:[#allocation2 + $0xd8] sm:$0xff]  ;;  %v206_v54 = vld [vmem:[#allocation2 + $0xe0] sm:$0xff]  ;;  %v207_v56 = vld [vmem:[#allocation2 + $0xe8] sm:$0xff] }
  0x39   : > { %1126 = vmatprep.subr.bf16.mxu0 %v1125_v44  ;;  %v1141_v55 = vpack.c.bf16 %v206_v54, %v205_v53  ;;  %v208_v57 = vld [vmem:[#allocation2 + $0xf0] sm:$0xff]  ;;  %v209_v59 = vld [vmem:[#allocation2 + $0xf8] sm:$0xff]  ;;  %v210_v60 = vld [vmem:[#allocation2 + $0x100] sm:$0xff] }
  0x3a   : > { %964 = vmatmul.mubr.msk.f32.gmra.mrb[4].mxu0 %vm218_vm0, %v167_v12  ;;  %v1145_v58 = vpack.c.bf16 %v208_v57, %v207_v56  ;;  %v1149_v61 = vpack.c.bf16 %v210_v60, %v209_v59  ;;  %v853_v62 = vld [vmem:[#allocation2 + $0x8] ss:$0 sm:$0xff]  ;;  %v212_v48 = vld [vmem:[#allocation2 + $0x110] sm:$0xff] }
  0x3b   : > { %966 = vmatprep.mubr.msk.f32.mxu0 %vm218_vm0, %v168_v15  ;;  %1108 = vmatpush3.bf16.msra.mxu1 %v1105_v21  ;;  %v211_v47 = vld [vmem:[#allocation2 + $0x108] sm:$0xff]  ;;  %v870_v50 = vld [vmem:[#allocation2 + $0x90] ss:$0 sm:$0xff] }
  0x3c   : > { %1110 = vmatprep.subr.bf16.mxu1 %v1109_v26  ;;  %1128 = vmatpush3.bf16.msra.mxu0 %v1125_v44 }
  0x3d   : > { %1130 = vmatprep.subr.bf16.mxu0 %v1129_v46 }
  0x3e   : > { %967 = vmatmul.mubr.msk.f32.gmra.mrb[6].mxu0 %vm218_vm0, %v169_v17 }
  0x3f   : > { %969 = vmatprep.mubr.msk.f32.mxu0 %vm218_vm0, %v170_v20  ;;  %1112 = vmatpush3.bf16.msra.mxu1 %v1109_v26 }
  0x40   : > { %1114 = vmatprep.subr.bf16.mxu1 %v1113_v31  ;;  %1132 = vmatpush3.bf16.msra.mxu0 %v1129_v46 }
  0x41   : > { %1134 = vmatprep.subr.bf16.mxu0 %v1133_v49 }
  0x42   : > { %970 = vmatmul.mubr.msk.f32.gmra.mrb[8].mxu0 %vm218_vm0, %v171_v22 }
  0x43   : > { %972 = vmatprep.mubr.msk.f32.mxu0 %vm218_vm0, %v172_v25  ;;  %1116 = vmatpush3.bf16.msra.mxu1 %v1113_v31 }
  0x44   : > { %1118 = vmatprep.subr.bf16.mxu1 %v1117_v36  ;;  %1136 = vmatpush3.bf16.msra.mxu0 %v1133_v49  ;;  %v1153_v49 = vpack.c.bf16 %v212_v48, %v211_v47 }
  0x45   : > { %1138 = vmatprep.subr.bf16.mxu0 %v1137_v52 }
  0x46   : > { %973 = vmatmul.mubr.msk.f32.gmra.mrb[10].mxu0 %vm218_vm0, %v173_v27 }
  0x47   : > { %975 = vmatprep.mubr.msk.f32.mxu0 %vm218_vm0, %v174_v30  ;;  %1120 = vmatpush3.bf16.msra.mxu1 %v1117_v36 }
  0x48   : > { %1122 = vmatprep.subr.bf16.mxu1 %v1121_v40  ;;  %1140 = vmatpush3.bf16.msra.mxu0 %v1137_v52 }
  0x49   : > { %1142 = vmatprep.subr.bf16.mxu0 %v1141_v55 }
  0x4a   : > { %976 = vmatmul.mubr.msk.f32.gmra.mrb[12].mxu0 %vm218_vm0, %v175_v32 }
  0x4b   : > { %978 = vmatprep.mubr.msk.f32.mxu0 %vm218_vm0, %v176_v35  ;;  %1124 = vmatpush3.bf16.msra.mxu1 %v1121_v40 }
  0x4c   : > { %1144 = vmatpush3.bf16.msra.mxu0 %v1141_v55 }
  0x4d   : > { %1146 = vmatprep.subr.bf16.mxu0 %v1145_v58 }
  0x4e   : > { %979 = vmatmul.mubr.msk.f32.gmra.mrb[14].mxu0 %vm218_vm0, %v177_v37 }
  0x50   : > { %1148 = vmatpush3.bf16.msra.mxu0 %v1145_v58 }
  0x51   : > { %1150 = vmatprep.subr.bf16.mxu0 %v1149_v61 }
  0x54   : > { %1152 = vmatpush3.bf16.msra.mxu0 %v1149_v61 }
  0x55   : > { %1154 = vmatprep.subr.bf16.mxu0 %v1153_v49 }
  0x58   : > { %1156 = vmatpush3.bf16.msra.mxu0 %v1153_v49 }
 0x105   : > { %v959_v63 = vpop.f32.mrb[0].mxu0 }
 0x106   : > { %v339_v0 = vadd.f32 %v959_v63, %v853_v62  ;;  %v333_v1 = vpop.f32.mrb[1].mxu0 }
 0x107   : > { %v334_v2 = vadd.f32 %v853_v62, %v333_v1 }
 0x108   : > { %v413_v5 = vmax.f32 %v339_v0, 0.0 }
 0x109   : > { %v962_v3 = vpop.f32.mrb[2].mxu0  ;;  %v412_v4 = vmax.f32 %v334_v2, 0.0 }
 0x10a   : > { %v349_v6 = vadd.f32 %v962_v3, %v853_v62  ;;  %v343_v7 = vpop.f32.mrb[3].mxu0 }
 0x10b   : > { %v344_v8 = vadd.f32 %v853_v62, %v343_v7  ;;  %1013 = vmatprep.mubr.f32.mxu1 %v412_v4 }
 0x10c   : > { %1014 = vmatmul.mubr.f32.vlgmr.msra.gmra.mrb[0].mxu1 %v413_v5  ;;  %v415_v11 = vmax.f32 %v349_v6, 0.0 }
 0x10d   : > { %v414_v9 = vmax.f32 %v344_v8, 0.0  ;;  %v965_v10 = vpop.f32.mrb[4].mxu0 }
 0x10e   : > { %v359_v12 = vadd.f32 %v965_v10, %v853_v62  ;;  %v353_v13 = vpop.f32.mrb[5].mxu0 }
 0x10f   : > { %v354_v14 = vadd.f32 %v853_v62, %v353_v13  ;;  %1016 = vmatprep.mubr.f32.mxu1 %v414_v9 }
 0x110   : > { %1017 = vmatmul.mubr.f32.gmra.mrb[2].mxu1 %v415_v11  ;;  %v417_v17 = vmax.f32 %v359_v12, 0.0 }
 0x111   : > { %v416_v15 = vmax.f32 %v354_v14, 0.0  ;;  %v968_v16 = vpop.f32.mrb[6].mxu0 }
 0x112   : > { %v369_v18 = vadd.f32 %v968_v16, %v853_v62  ;;  %v363_v19 = vpop.f32.mrb[7].mxu0 }
 0x113   : > { %v364_v20 = vadd.f32 %v853_v62, %v363_v19  ;;  %1019 = vmatprep.mubr.f32.mxu1 %v416_v15 }
 0x114   : > { %1020 = vmatmul.mubr.f32.gmra.mrb[4].mxu1 %v417_v17  ;;  %v419_v23 = vmax.f32 %v369_v18, 0.0 }
 0x115   : > { %v418_v21 = vmax.f32 %v364_v20, 0.0  ;;  %v971_v22 = vpop.f32.mrb[8].mxu0 }
 0x116   : > { %v379_v24 = vadd.f32 %v971_v22, %v853_v62  ;;  %v373_v25 = vpop.f32.mrb[9].mxu0 }
 0x117   : > { %v374_v26 = vadd.f32 %v853_v62, %v373_v25  ;;  %1022 = vmatprep.mubr.f32.mxu1 %v418_v21 }
 0x118   : > { %1023 = vmatmul.mubr.f32.gmra.mrb[6].mxu1 %v419_v23  ;;  %v421_v29 = vmax.f32 %v379_v24, 0.0 }
 0x119   : > { %v420_v27 = vmax.f32 %v374_v26, 0.0  ;;  %v974_v28 = vpop.f32.mrb[10].mxu0 }
 0x11a   : > { %v389_v30 = vadd.f32 %v974_v28, %v853_v62  ;;  %v383_v31 = vpop.f32.mrb[11].mxu0 }
 0x11b   : > { %v384_v32 = vadd.f32 %v853_v62, %v383_v31  ;;  %1025 = vmatprep.mubr.f32.mxu1 %v420_v27 }
 0x11c   : > { %1026 = vmatmul.mubr.f32.gmra.mrb[8].mxu1 %v421_v29  ;;  %v423_v35 = vmax.f32 %v389_v30, 0.0 }
 0x11d   : > { %v422_v33 = vmax.f32 %v384_v32, 0.0  ;;  %v977_v34 = vpop.f32.mrb[12].mxu0 }
 0x11e   : > { %v399_v36 = vadd.f32 %v977_v34, %v853_v62  ;;  %v393_v37 = vpop.f32.mrb[13].mxu0 }
 0x11f   : > { %v394_v38 = vadd.f32 %v853_v62, %v393_v37  ;;  %1028 = vmatprep.mubr.f32.mxu1 %v422_v33 }
 0x120   : > { %1029 = vmatmul.mubr.f32.gmra.mrb[10].mxu1 %v423_v35  ;;  %v425_v41 = vmax.f32 %v399_v36, 0.0  ;;  %v1360_v35 = vld [vmem:[#allocation2 + $0x118] ss:$0 sm:$0xff] }
 0x121   : > { %v424_v39 = vmax.f32 %v394_v38, 0.0  ;;  %v980_v40 = vpop.f32.mrb[14].mxu0 }
 0x122   : > { %v409_v42 = vadd.f32 %v980_v40, %v853_v62  ;;  %v403_v43 = vpop.f32.mrb[15].mxu0 }
 0x123   : > { %v404_v44 = vadd.f32 %v853_v62, %v403_v43  ;;  %1031 = vmatprep.mubr.f32.mxu1 %v424_v39 }
 0x124   : > { %1032 = vmatmul.mubr.f32.gmra.mrb[12].mxu1 %v425_v41  ;;  %v427_v46 = vmax.f32 %v409_v42, 0.0 }
 0x125   : > { %v426_v45 = vmax.f32 %v404_v44, 0.0 }
 0x127   : > { %1034 = vmatprep.mubr.f32.mxu1 %v426_v45 }
 0x128   : > { %1035 = vmatmul.mubr.f32.gmra.mrb[14].mxu1 %v427_v46 }
 0x1df   : > { %v1015_v51 = vpop.f32.mrb[0].mxu1 }
 0x1e0   : > { %v504_v52 = vadd.f32 %v1015_v51, %v870_v50  ;;  %v498_v53 = vpop.f32.mrb[1].mxu1 }
 0x1e1   : > { %v499_v54 = vadd.f32 %v870_v50, %v498_v53 }
 0x1e2   : > { %v578_v57 = vmax.f32 %v504_v52, 0.0 }
 0x1e3   : > { %v577_v55 = vmax.f32 %v499_v54, 0.0  ;;  %v1018_v56 = vpop.f32.mrb[2].mxu1 }
 0x1e4   : > { %v514_v58 = vadd.f32 %v1018_v56, %v870_v50  ;;  %v508_v59 = vpop.f32.mrb[3].mxu1 }
 0x1e5   : > { %v509_v60 = vadd.f32 %v870_v50, %v508_v59  ;;  %1069 = vmatprep.mubr.f32.mxu0 %v577_v55 }
 0x1e6   : > { %1070 = vmatmul.mubr.f32.vlgmr.msra.gmra.mrb[16].mxu0 %v578_v57  ;;  %v580_v63 = vmax.f32 %v514_v58, 0.0 }
 0x1e7   : > { %v579_v61 = vmax.f32 %v509_v60, 0.0  ;;  %v1021_v62 = vpop.f32.mrb[4].mxu1 }
 0x1e8   : > { %v524_v0 = vadd.f32 %v1021_v62, %v870_v50  ;;  %v518_v1 = vpop.f32.mrb[5].mxu1 }
 0x1e9   : > { %v519_v2 = vadd.f32 %v870_v50, %v518_v1  ;;  %1072 = vmatprep.mubr.f32.mxu0 %v579_v61 }
 0x1ea   : > { %1073 = vmatmul.mubr.f32.gmra.mrb[18].mxu0 %v580_v63  ;;  %v582_v5 = vmax.f32 %v524_v0, 0.0 }
 0x1eb   : > { %v581_v3 = vmax.f32 %v519_v2, 0.0  ;;  %v1024_v4 = vpop.f32.mrb[6].mxu1 }
 0x1ec   : > { %v534_v6 = vadd.f32 %v1024_v4, %v870_v50  ;;  %v528_v7 = vpop.f32.mrb[7].mxu1 }
 0x1ed   : > { %v529_v8 = vadd.f32 %v870_v50, %v528_v7  ;;  %1075 = vmatprep.mubr.f32.mxu0 %v581_v3 }
 0x1ee   : > { %1076 = vmatmul.mubr.f32.gmra.mrb[20].mxu0 %v582_v5  ;;  %v584_v11 = vmax.f32 %v534_v6, 0.0 }
 0x1ef   : > { %v583_v9 = vmax.f32 %v529_v8, 0.0  ;;  %v1027_v10 = vpop.f32.mrb[8].mxu1 }
 0x1f0   : > { %v544_v12 = vadd.f32 %v1027_v10, %v870_v50  ;;  %v538_v13 = vpop.f32.mrb[9].mxu1 }
 0x1f1   : > { %v539_v14 = vadd.f32 %v870_v50, %v538_v13  ;;  %1078 = vmatprep.mubr.f32.mxu0 %v583_v9 }
 0x1f2   : > { %1079 = vmatmul.mubr.f32.gmra.mrb[22].mxu0 %v584_v11  ;;  %v586_v17 = vmax.f32 %v544_v12, 0.0 }
 0x1f3   : > { %v585_v15 = vmax.f32 %v539_v14, 0.0  ;;  %v1030_v16 = vpop.f32.mrb[10].mxu1 }
 0x1f4   : > { %v554_v18 = vadd.f32 %v1030_v16, %v870_v50  ;;  %v548_v19 = vpop.f32.mrb[11].mxu1 }
 0x1f5   : > { %v549_v20 = vadd.f32 %v870_v50, %v548_v19  ;;  %1081 = vmatprep.mubr.f32.mxu0 %v585_v15 }
 0x1f6   : > { %1082 = vmatmul.mubr.f32.gmra.mrb[24].mxu0 %v586_v17  ;;  %v588_v23 = vmax.f32 %v554_v18, 0.0 }
 0x1f7   : > { %v587_v21 = vmax.f32 %v549_v20, 0.0  ;;  %v1033_v22 = vpop.f32.mrb[12].mxu1 }
 0x1f8   : > { %v564_v24 = vadd.f32 %v1033_v22, %v870_v50  ;;  %v558_v25 = vpop.f32.mrb[13].mxu1 }
 0x1f9   : > { %v559_v26 = vadd.f32 %v870_v50, %v558_v25  ;;  %1084 = vmatprep.mubr.f32.mxu0 %v587_v21 }
 0x1fa   : > { %1085 = vmatmul.mubr.f32.gmra.mrb[26].mxu0 %v588_v23  ;;  %v590_v29 = vmax.f32 %v564_v24, 0.0 }
 0x1fb   : > { %v589_v27 = vmax.f32 %v559_v26, 0.0  ;;  %v1036_v28 = vpop.f32.mrb[14].mxu1 }
 0x1fc   : > { %v574_v30 = vadd.f32 %v1036_v28, %v870_v50  ;;  %v568_v31 = vpop.f32.mrb[15].mxu1 }
 0x1fd   : > { %v569_v32 = vadd.f32 %v870_v50, %v568_v31  ;;  %1087 = vmatprep.mubr.f32.mxu0 %v589_v27 }
 0x1fe   : > { %1088 = vmatmul.mubr.f32.gmra.mrb[28].mxu0 %v590_v29  ;;  %v592_v34 = vmax.f32 %v574_v30, 0.0 }
 0x1ff   : > { %v591_v33 = vmax.f32 %v569_v32, 0.0 }
 0x201   : > { %1090 = vmatprep.mubr.f32.mxu0 %v591_v33 }
 0x202   : > { %1091 = vmatmul.mubr.f32.gmra.mrb[30].mxu0 %v592_v34 }
 0x2b9   : > { %v1071_v36 = vpop.f32.mrb[16].mxu0 }
 0x2ba   : > { %v669_v37 = vadd.f32 %v1071_v36, %v1360_v35  ;;  %v663_v38 = vpop.f32.mrb[17].mxu0 }
 0x2bb   : > { %v664_v39 = vadd.f32 %v1360_v35, %v663_v38 }
 0x2bc   : > { %1178 = vtanh.f32 %v669_v37 }
 0x2bd   : > { %1180 = vtanh.f32 %v664_v39  ;;  %v1074_v40 = vpop.f32.mrb[18].mxu0 }
 0x2be   : > { %v679_v41 = vadd.f32 %v1074_v40, %v1360_v35  ;;  %v673_v42 = vpop.f32.mrb[19].mxu0 }
 0x2bf   : > { %v674_v43 = vadd.f32 %v1360_v35, %v673_v42 }
 0x2c0   : > { %1182 = vtanh.f32 %v679_v41 }
 0x2c1   : > { %1184 = vtanh.f32 %v674_v43  ;;  %v1077_v44 = vpop.f32.mrb[20].mxu0 }
 0x2c2   : > { %v689_v45 = vadd.f32 %v1077_v44, %v1360_v35  ;;  %v683_v46 = vpop.f32.mrb[21].mxu0 }
 0x2c3   : > { %v684_v47 = vadd.f32 %v1360_v35, %v683_v46 }
 0x2c4   : > { %1186 = vtanh.f32 %v689_v45 }
 0x2c5   : > { %1188 = vtanh.f32 %v684_v47  ;;  %v1080_v48 = vpop.f32.mrb[22].mxu0 }
 0x2c6   : > { %v1179_v49 = vpop.eup %1178  ;;  %v699_v50 = vadd.f32 %v1080_v48, %v1360_v35  ;;  %v693_v51 = vpop.f32.mrb[23].mxu0 }
 0x2c7   : > { %v1181_v52 = vpop.eup %1180  ;;  %759 = vst [vmem:[%s1373_s7 + $0x8] sm:$0xff] %v1179_v49  ;;  %v694_v53 = vadd.f32 %v1360_v35, %v693_v51 }
 0x2c8   : > { %758 = vst [vmem:[%s1373_s7] sm:$0xff] %v1181_v52  ;;  %1190 = vtanh.f32 %v699_v50 }
 0x2c9   : > { %1192 = vtanh.f32 %v694_v53  ;;  %v1083_v54 = vpop.f32.mrb[24].mxu0 }
 0x2ca   : > { %v1183_v55 = vpop.eup %1182  ;;  %v709_v56 = vadd.f32 %v1083_v54, %v1360_v35  ;;  %v703_v57 = vpop.f32.mrb[25].mxu0 }
 0x2cb   : > { %v1185_v58 = vpop.eup %1184  ;;  %761 = vst [vmem:[%s1373_s7 + $0x18] sm:$0xff] %v1183_v55  ;;  %v704_v59 = vadd.f32 %v1360_v35, %v703_v57 }
 0x2cc   : > { %760 = vst [vmem:[%s1373_s7 + $0x10] sm:$0xff] %v1185_v58  ;;  %1194 = vtanh.f32 %v709_v56 }
 0x2cd   : > { %1196 = vtanh.f32 %v704_v59  ;;  %v1086_v60 = vpop.f32.mrb[26].mxu0 }
 0x2ce   : > { %v1187_v61 = vpop.eup %1186  ;;  %v719_v62 = vadd.f32 %v1086_v60, %v1360_v35  ;;  %v713_v63 = vpop.f32.mrb[27].mxu0 }
 0x2cf   : > { %v1189_v0 = vpop.eup %1188  ;;  %763 = vst [vmem:[%s1373_s7 + $0x28] sm:$0xff] %v1187_v61  ;;  %v714_v1 = vadd.f32 %v1360_v35, %v713_v63 }
 0x2d0   : > { %762 = vst [vmem:[%s1373_s7 + $0x20] sm:$0xff] %v1189_v0  ;;  %1198 = vtanh.f32 %v719_v62 }
 0x2d1   : > { %1200 = vtanh.f32 %v714_v1  ;;  %v1089_v2 = vpop.f32.mrb[28].mxu0 }
 0x2d2   : > { %v1191_v3 = vpop.eup %1190  ;;  %v729_v4 = vadd.f32 %v1089_v2, %v1360_v35  ;;  %v723_v5 = vpop.f32.mrb[29].mxu0 }
 0x2d3   : > { %v1193_v6 = vpop.eup %1192  ;;  %765 = vst [vmem:[%s1373_s7 + $0x38] sm:$0xff] %v1191_v3  ;;  %v724_v7 = vadd.f32 %v1360_v35, %v723_v5 }
 0x2d4   : > { %764 = vst [vmem:[%s1373_s7 + $0x30] sm:$0xff] %v1193_v6  ;;  %1202 = vtanh.f32 %v729_v4 }
 0x2d5   : > { %1204 = vtanh.f32 %v724_v7  ;;  %v1092_v8 = vpop.f32.mrb[30].mxu0 }
 0x2d6   : > { %v1195_v9 = vpop.eup %1194  ;;  %v739_v10 = vadd.f32 %v1092_v8, %v1360_v35  ;;  %v733_v11 = vpop.f32.mrb[31].mxu0 }
 0x2d7   : > { %v1197_v12 = vpop.eup %1196  ;;  %767 = vst [vmem:[%s1373_s7 + $0x48] sm:$0xff] %v1195_v9  ;;  %v734_v13 = vadd.f32 %v1360_v35, %v733_v11 }
 0x2d8   : > { %766 = vst [vmem:[%s1373_s7 + $0x40] sm:$0xff] %v1197_v12  ;;  %1206 = vtanh.f32 %v739_v10 }
 0x2d9   : > { %1208 = vtanh.f32 %v734_v13 }
 0x2da   : > { %v1199_v14 = vpop.eup %1198 }
 0x2db   : > { %v1201_v15 = vpop.eup %1200  ;;  %769 = vst [vmem:[%s1373_s7 + $0x58] sm:$0xff] %v1199_v14 }
 0x2dc   : > { %768 = vst [vmem:[%s1373_s7 + $0x50] sm:$0xff] %v1201_v15 }
 0x2de   : > { %v1203_v16 = vpop.eup %1202 }
 0x2df   : > { %v1205_v17 = vpop.eup %1204  ;;  %771 = vst [vmem:[%s1373_s7 + $0x68] sm:$0xff] %v1203_v16 }
 0x2e0   : > { %770 = vst [vmem:[%s1373_s7 + $0x60] sm:$0xff] %v1205_v17 }
 0x2e2   : > { %v1207_v18 = vpop.eup %1206 }
 0x2e3   : > { %v1209_v19 = vpop.eup %1208  ;;  %773 = vst [vmem:[%s1373_s7 + $0x78] sm:$0xff] %v1207_v18 }
 0x2e4   : > { %772 = vst [vmem:[%s1373_s7 + $0x70] sm:$0xff] %v1209_v19 }
 0x2e5 PF: > { %s13_s9 = sadd.s32 1, %s1248_s9  }
 0x2e6   : > { %p10_p3 = scmp.ge.s32.totalorder %s13_s9, 4  }
 0x2e8   :  { %12 = sbr.rel (!%p10_p3) target bundleno = 1 (0x1), region = 63 }
 0x2ef   :  { %796 = vsyncpa [#allocation3], 1 }
 0x2f0   :  { %798 = vsyncpa [#allocation3 + $0x1], 1 }

</bundles_post_ra>
